<compile_context>
chip_gen: v5e
topology: v5e:2x2
jax: 0.10.0
libtpu: 0.0.40
codegen_flags: <defaults>
</compile_context>

<pallas_src>
import jax
import jax.numpy as jnp
from jax import lax
from jax.experimental import pallas as pl
from jax.experimental.pallas import tpu as pltpu


def _round_up(n, m):
    return ((n + m - 1) // m) * m


# ----------------------------------------------------------------------------
# Kernel
# ----------------------------------------------------------------------------
def proto_kernel(x_ref, w1_ref, b1_ref, proto_ref, p2_ref, w2_ref, b2_ref, out_ref):
    # x_ref:     [TB, Kp]  bf16  flattened embeddings (Dropout=id, Flatten), zero-padded K->Kp
    # w1_ref:    [Kp, Hp]  bf16  prototype Linear weight, [in, out], zero-padded
    # b1_ref:    [1,  Hp]  f32   prototype Linear bias, zero-padded
    # proto_ref: [Cp, Hp]  f32   proto_point, zero-padded rows C..Cp-1
    # p2_ref:    [1,  Cp]  f32   ||proto||^2 per class, zero in padded lanes
    # w2_ref:    [Cp, Cp]  f32   BN-folded last Linear weight, [in, out], zero-padded
    # b2_ref:    [1,  Cp]  f32   BN-folded last Linear bias, zero-padded
    # out_ref:   [TB, Cp]  f32   lane-dense output block

    # --- self.prototype: Flatten + Linear(input_dim*14, hidden_dim) ---
    x_pt = jnp.dot(x_ref[...], w1_ref[...],
                   preferred_element_type=jnp.float32) + b1_ref[...]          # [TB, Hp]

    # --- torch.cdist(x_pt, proto_point), p=2, expanded form (no transposes) ---
    x2 = jnp.sum(x_pt * x_pt, axis=-1, keepdims=True)                         # [TB, 1]
    xp = lax.dot_general(x_pt, proto_ref[...], (((1,), (1,)), ((), ())),
                         preferred_element_type=jnp.float32)                  # [TB, Cp]
    d2 = jnp.maximum(x2 + p2_ref[...] - 2.0 * xp, 0.0)
    dist = jnp.sqrt(d2)                                                       # [TB, Cp]
    # Padded columns: p2=0, xp=0 -> dist = ||x_pt||; they never leak because the
    # corresponding rows of w2_p are exactly zero.

    # --- self.last: (BatchNorm folded) -> Dropout(id) -> Linear -> Sigmoid ---
    y = jnp.dot(dist, w2_ref[...], preferred_element_type=jnp.float32) + b2_ref[...]
    out_ref[...] = jax.nn.sigmoid(y)


# ----------------------------------------------------------------------------
# Wrapper
# ----------------------------------------------------------------------------
def prototypical_forward(x_flat, params, *, block_b=512):
    """x_flat: [B, input_dim*14] float32.  Returns [B, num_class] float32."""
    w1_p = params["w1_p"]
    Kp, Hp = w1_p.shape
    Cp = params["w2_p"].shape[1]
    C = int(params["num_class"])
    B, K = x_flat.shape

    # bf16 stream for the dominant HBM traffic; accumulation stays f32 in-kernel.
    x_b = x_flat.astype(jnp.bfloat16)
    if K < Kp:
        x_b = jnp.pad(x_b, ((0, 0), (0, Kp - K)))

    # Batch tiling: TB rows per grid step (multiple of 8 sublanes).
    TB = min(block_b, _round_up(B, 8))
    if B > 16:
        # v7x megacore: keep >= 2 grid steps so the parallel axis splits across
        # both TensorCores (and double-buffering actually pipelines).
        TB = min(TB, _round_up((B + 1) // 2, 8))
    Bp = _round_up(B, TB)
    if Bp > B:
        x_b = jnp.pad(x_b, ((0, Bp - B), (0, 0)))

    cost = pl.CostEstimate(
        flops=int(2 * Bp * (Kp * Hp + Hp * Cp + Cp * Cp)),
        transcendentals=int(3 * Bp * Cp),  # sqrt + exp + recip per output element
        bytes_accessed=int(2 * Bp * Kp + 2 * Kp * Hp + 4 * Hp
                           + 4 * Cp * Hp + 4 * Cp + 4 * Cp * Cp + 4 * Cp
                           + 4 * Bp * Cp),
    )

    out = pl.pallas_call(
        proto_kernel,
        out_shape=jax.ShapeDtypeStruct((Bp, Cp), jnp.float32),
        grid=(Bp // TB,),
        in_specs=[
            pl.BlockSpec((TB, Kp), lambda i: (i, 0)),   # x: streamed over batch
            pl.BlockSpec((Kp, Hp), lambda i: (0, 0)),   # w1 (bf16): resident
            pl.BlockSpec((1, Hp), lambda i: (0, 0)),    # b1: resident
            pl.BlockSpec((Cp, Hp), lambda i: (0, 0)),   # proto_point: resident
            pl.BlockSpec((1, Cp), lambda i: (0, 0)),    # ||proto||^2: resident
            pl.BlockSpec((Cp, Cp), lambda i: (0, 0)),   # BN-folded last Linear: resident
            pl.BlockSpec((1, Cp), lambda i: (0, 0)),    # BN-folded bias: resident
        ],
        out_specs=pl.BlockSpec((TB, Cp), lambda i: (i, 0)),
        compiler_params=pltpu.CompilerParams(dimension_semantics=("parallel",)),
        cost_estimate=cost,
    )(x_b, w1_p, params["b1_p"], params["proto_p"], params["p2_p"],
      params["w2_p"], params["b2_p"])
    return out[:B, :C]


# ----------------------------------------------------------------------------
# Parameter construction (PyTorch layouts) and offline folding / padding
# ----------------------------------------------------------------------------
def init_raw_params(key, input_dim, hidden_dim, num_class, seq_len, vocab):
    ks = jax.random.split(key, 10)
    flat_dim = input_dim * seq_len
    return {
        # stand-in "bert" embedding table (glue, not part of the kernel)
        "emb_table": jax.random.normal(ks[0], (vocab, input_dim), jnp.float32) * 0.1,
        # self.prototype Linear(input_dim*14, hidden_dim), PyTorch layout [out, in]
        "w1": jax.random.normal(ks[1], (hidden_dim, flat_dim), jnp.float32) * (1.0 / flat_dim ** 0.5),
        "b1": jax.random.normal(ks[2], (hidden_dim,), jnp.float32) * 0.01,
        # self.proto_point = nn.Parameter(torch.randn(num_class, hidden_dim))
        "proto": jax.random.normal(ks[3], (num_class, hidden_dim), jnp.float32),
        # BatchNorm1d(num_class) — eval mode; non-trivial stats to exercise folding
        "bn_gamma": 1.0 + 0.1 * jax.random.normal(ks[4], (num_class,), jnp.float32),
        "bn_beta": 0.1 * jax.random.normal(ks[5], (num_class,), jnp.float32),
        "bn_mean": 0.1 * jax.random.normal(ks[6], (num_class,), jnp.float32),
        "bn_var": 1.0 + 0.5 * jax.random.uniform(ks[7], (num_class,), jnp.float32),
        # self.last Linear(num_class, num_class), PyTorch layout [out, in]
        "w2": jax.random.normal(ks[8], (num_class, num_class), jnp.float32) * (1.0 / num_class ** 0.5),
        "b2": jax.random.normal(ks[9], (num_class,), jnp.float32) * 0.01,
    }


def prepare_params(raw, eps=1e-5):
    """Fold BN, pre-transpose weights, precompute proto norms, lane/sublane-pad."""
    w1 = raw["w1"]                       # [H, K] PyTorch layout
    H, K = w1.shape
    C = raw["proto"].shape[0]
    Kp = _round_up(K, 128)
    Hp = _round_up(H, 128)
    Cp = _round_up(C, 128)

    # Prototype Linear weight -> [in, out], zero-padded, stored bf16 (MXU-native).
    w1_p = jnp.zeros((Kp, Hp), jnp.float32).at[:K, :H].set(w1.T).astype(jnp.bfloat16)
    b1_p = jnp.zeros((1, Hp), jnp.float32).at[0, :H].set(raw["b1"])

    # proto_point padded to [Cp, Hp]; padded rows are exactly zero.
    proto_p = jnp.zeros((Cp, Hp), jnp.float32).at[:C, :H].set(raw["proto"])
    # ||proto||^2 precomputed once; zero in padded lanes.
    p2_p = jnp.zeros((1, Cp), jnp.float32).at[0, :C].set(
        jnp.sum(raw["proto"] * raw["proto"], axis=-1))

    # Fold eval-mode BatchNorm into the last Linear:
    #   bn = (d - mean) * gamma * rsqrt(var+eps) + beta = d*s + c
    #   y  = bn @ W2^T + b2 = d @ (s[:,None] * W2^T) + (c @ W2^T + b2)
    s = raw["bn_gamma"] * lax.rsqrt(raw["bn_var"] + eps)     # [C]
    c = raw["bn_beta"] - raw["bn_mean"] * s                  # [C]
    w2_fold = raw["w2"].T * s[:, None]                       # [C_in, C_out]
    b2_fold = raw["b2"] + c @ raw["w2"].T                    # [C_out]

    # Zero-pad to [Cp, Cp] / [1, Cp]: padded ROWS of w2_p must be exactly zero so
    # garbage dist columns never leak; padded output columns are sliced away.
    w2_p = jnp.zeros((Cp, Cp), jnp.float32).at[:C, :C].set(w2_fold)
    b2_p = jnp.zeros((1, Cp), jnp.float32).at[0, :C].set(b2_fold)

    return {"w1_p": w1_p, "b1_p": b1_p, "proto_p": proto_p, "p2_p": p2_p,
            "w2_p": w2_p, "b2_p": b2_p, "num_class": C}


# ----------------------------------------------------------------------------
# Pure-JAX references (un-folded, un-padded) for correctness checking
# ----------------------------------------------------------------------------
def reference_forward(x_flat, raw, eps=1e-5, bf16_inputs=False):
    w1 = raw["w1"]
    if bf16_inputs:   # mimic the kernel's bf16 input/weight rounding (f32 math)
        x_flat = x_flat.astype(jnp.bfloat16).astype(jnp.float32)
        w1 = w1.astype(jnp.bfloat16).astype(jnp.float32)
    x_pt = x_flat @ w1.T + raw["b1"]
    diff = x_pt[:, None, :] - raw["proto"][None, :, :]
    dist = jnp.sqrt(jnp.sum(diff * diff, axis=-1))
    bn = (dist - raw["bn_mean"]) * (raw["bn_gamma"] * lax.rsqrt(raw["bn_var"] + eps)) + raw["bn_beta"]
    y = bn @ raw["w2"].T + raw["b2"]
    return jax.nn.sigmoid(y)


if __name__ == "__main__":
    # Seq length is hard-wired to 14 by Linear(input_dim * 14, hidden_dim).
    B, SEQ, INPUT_DIM, HIDDEN_DIM, NUM_CLASS, VOCAB = 8, 14, 32, 32, 8, 100

    key = jax.random.PRNGKey(0)
    k_param, k_tok = jax.random.split(key)
    raw = init_raw_params(k_param, INPUT_DIM, HIDDEN_DIM, NUM_CLASS, SEQ, VOCAB)
    params = prepare_params(raw)

    # token ids -> embeddings (stand-in for bert_embedding(...).last_hidden_state)
    token_ids = jax.random.randint(k_tok, (B, SEQ), 0, VOCAB)
    inputs_embedding = raw["emb_table"][token_ids].astype(jnp.float32)   # [B, 14, D]

    # Dropout (eval) is identity; Flatten happens here (glue).
    x_flat = inputs_embedding.reshape(B, SEQ * INPUT_DIM)                # [B, 14*D]

    out = prototypical_forward(x_flat, params)
    out = jax.block_until_ready(out)

    ref_bf16 = reference_forward(x_flat, raw, bf16_inputs=True)   # kernel-math check
    ref_f32 = reference_forward(x_flat, raw, bf16_inputs=False)   # full-precision check

    assert out.shape == (B, NUM_CLASS)
    assert out.dtype == jnp.float32
    assert bool(jnp.all((out >= 0.0) & (out <= 1.0)))              # sigmoid range
    # Tight vs. a reference that sees the same bf16-rounded x / w1:
    assert bool(jnp.allclose(out, ref_bf16, rtol=1e-4, atol=1e-4)), \
        float(jnp.max(jnp.abs(out - ref_bf16)))
    # Loose vs. full f32 reference (bounds the bf16 input-rounding impact):
    assert bool(jnp.allclose(out, ref_f32, rtol=5e-3, atol=5e-3)), \
        float(jnp.max(jnp.abs(out - ref_f32)))
    print("KERNEL_OK")
</pallas_src>

<mosaic_0001>
module attributes {stable_mosaic.version = 11 : i64} {
  func.func @proto_kernel(%arg0: i32, %arg1: memref<8x512xbf16, #tpu.memory_space<vmem>>, %arg2: memref<512x128xbf16, #tpu.memory_space<vmem>>, %arg3: memref<1x128xf32, #tpu.memory_space<vmem>>, %arg4: memref<128x128xf32, #tpu.memory_space<vmem>>, %arg5: memref<1x128xf32, #tpu.memory_space<vmem>>, %arg6: memref<128x128xf32, #tpu.memory_space<vmem>>, %arg7: memref<1x128xf32, #tpu.memory_space<vmem>>, %arg8: memref<8x128xf32, #tpu.memory_space<vmem>>) attributes {dimension_semantics = [#tpu.dimension_semantics<parallel>], iteration_bounds = array<i64: 1>, scalar_prefetch = 0 : i64, scratch_operands = 0 : i64, tpu.core_type = #tpu.core_type<tc>, window_params = [{transform_indices = @transform_0, window_bounds = array<i64: 8, 512>}, {pipeline_mode = #tpu.pipeline_mode<synchronous>, transform_indices = @transform_1, window_bounds = array<i64: 512, 128>}, {pipeline_mode = #tpu.pipeline_mode<synchronous>, transform_indices = @transform_2, window_bounds = array<i64: 1, 128>}, {pipeline_mode = #tpu.pipeline_mode<synchronous>, transform_indices = @transform_3, window_bounds = array<i64: 128, 128>}, {pipeline_mode = #tpu.pipeline_mode<synchronous>, transform_indices = @transform_4, window_bounds = array<i64: 1, 128>}, {pipeline_mode = #tpu.pipeline_mode<synchronous>, transform_indices = @transform_5, window_bounds = array<i64: 128, 128>}, {pipeline_mode = #tpu.pipeline_mode<synchronous>, transform_indices = @transform_6, window_bounds = array<i64: 1, 128>}, {transform_indices = @transform_7, window_bounds = array<i64: 8, 128>}]} {
    %c0 = arith.constant 0 : index
    %c0_0 = arith.constant 0 : index
    %0 = vector.load %arg1[%c0, %c0_0] : memref<8x512xbf16, #tpu.memory_space<vmem>>, vector<8x512xbf16>
    %c0_1 = arith.constant 0 : index
    %c0_2 = arith.constant 0 : index
    %1 = vector.load %arg2[%c0_1, %c0_2] : memref<512x128xbf16, #tpu.memory_space<vmem>>, vector<512x128xbf16>
    %cst = arith.constant dense<0.000000e+00> : vector<8x128xf32>
    %2 = tpu.matmul %0, %1, %cst {dimension_numbers = #tpu.dot_dimension_numbers<[1], [0], [0], [1], [0, 0, 1, 1], [], []>} : vector<8x512xbf16>, vector<512x128xbf16>, vector<8x128xf32> -> vector<8x128xf32>
    %c0_3 = arith.constant 0 : index
    %c0_4 = arith.constant 0 : index
    %3 = vector.load %arg3[%c0_3, %c0_4] : memref<1x128xf32, #tpu.memory_space<vmem>>, vector<1x128xf32>
    %4 = vector.broadcast %3 : vector<1x128xf32> to vector<8x128xf32>
    %5 = arith.addf %2, %4 : vector<8x128xf32>
    %6 = arith.mulf %5, %5 : vector<8x128xf32>
    %cst_5 = arith.constant dense<0.000000e+00> : vector<8xf32>
    %7 = vector.multi_reduction <add>, %6, %cst_5 [1] : vector<8x128xf32> to vector<8xf32>
    %8 = vector.shape_cast %7 : vector<8xf32> to vector<8x1xf32>
    %c0_6 = arith.constant 0 : index
    %c0_7 = arith.constant 0 : index
    %9 = vector.load %arg4[%c0_6, %c0_7] : memref<128x128xf32, #tpu.memory_space<vmem>>, vector<128x128xf32>
    %cst_8 = arith.constant dense<0.000000e+00> : vector<8x128xf32>
    %10 = tpu.matmul %5, %9, %cst_8 {dimension_numbers = #tpu.dot_dimension_numbers<[1], [1], [0], [0], [0, 0, 1, 0], [], []>} : vector<8x128xf32>, vector<128x128xf32>, vector<8x128xf32> -> vector<8x128xf32>
    %c0_9 = arith.constant 0 : index
    %c0_10 = arith.constant 0 : index
    %11 = vector.load %arg5[%c0_9, %c0_10] : memref<1x128xf32, #tpu.memory_space<vmem>>, vector<1x128xf32>
    %12 = vector.broadcast %8 : vector<8x1xf32> to vector<8x128xf32>
    %13 = vector.broadcast %11 : vector<1x128xf32> to vector<8x128xf32>
    %14 = arith.addf %12, %13 : vector<8x128xf32>
    %cst_11 = arith.constant 2.000000e+00 : f32
    %15 = vector.broadcast %cst_11 : f32 to vector<8x128xf32>
    %16 = arith.mulf %15, %10 : vector<8x128xf32>
    %17 = arith.subf %14, %16 : vector<8x128xf32>
    %cst_12 = arith.constant 0.000000e+00 : f32
    %18 = vector.broadcast %cst_12 : f32 to vector<8x128xf32>
    %19 = arith.maximumf %17, %18 : vector<8x128xf32>
    %20 = math.sqrt %19 : vector<8x128xf32>
    %c0_13 = arith.constant 0 : index
    %c0_14 = arith.constant 0 : index
    %21 = vector.load %arg6[%c0_13, %c0_14] : memref<128x128xf32, #tpu.memory_space<vmem>>, vector<128x128xf32>
    %cst_15 = arith.constant dense<0.000000e+00> : vector<8x128xf32>
    %22 = tpu.matmul %20, %21, %cst_15 {dimension_numbers = #tpu.dot_dimension_numbers<[1], [0], [0], [1], [0, 0, 1, 1], [], []>} : vector<8x128xf32>, vector<128x128xf32>, vector<8x128xf32> -> vector<8x128xf32>
    %c0_16 = arith.constant 0 : index
    %c0_17 = arith.constant 0 : index
    %23 = vector.load %arg7[%c0_16, %c0_17] : memref<1x128xf32, #tpu.memory_space<vmem>>, vector<1x128xf32>
    %24 = vector.broadcast %23 : vector<1x128xf32> to vector<8x128xf32>
    %25 = arith.addf %22, %24 : vector<8x128xf32>
    %26 = arith.negf %25 : vector<8x128xf32>
    %27 = math.exp %26 : vector<8x128xf32>
    %cst_18 = arith.constant 1.000000e+00 : f32
    %28 = vector.broadcast %cst_18 : f32 to vector<8x128xf32>
    %29 = arith.addf %28, %27 : vector<8x128xf32>
    %30 = arith.divf %28, %29 : vector<8x128xf32>
    %c0_19 = arith.constant 0 : index
    %c0_20 = arith.constant 0 : index
    %31 = vector.load %arg8[%c0_19, %c0_20] : memref<8x128xf32, #tpu.memory_space<vmem>>, vector<8x128xf32>
    tpu.vector_store %arg8[%c0_19, %c0_20], %30 {strides = array<i32>} : memref<8x128xf32, #tpu.memory_space<vmem>>, vector<8x128xf32>,
    return
  }
  func.func @transform_0(%arg0: i32) -> (i32, i32) {
    %c0_i32 = arith.constant 0 : i32
    %c0_i32_0 = arith.constant 0 : i32
    return %arg0, %c0_i32 : i32, i32
  }
  func.func @transform_1(%arg0: i32) -> (i32, i32) {
    %c0_i32 = arith.constant 0 : i32
    %c0_i32_0 = arith.constant 0 : i32
    %c0_i32_1 = arith.constant 0 : i32
    return %c0_i32, %c0_i32_0 : i32, i32
  }
  func.func @transform_2(%arg0: i32) -> (i32, i32) {
    %c0_i32 = arith.constant 0 : i32
    %c0_i32_0 = arith.constant 0 : i32
    %c0_i32_1 = arith.constant 0 : i32
    return %c0_i32, %c0_i32_0 : i32, i32
  }
  func.func @transform_3(%arg0: i32) -> (i32, i32) {
    %c0_i32 = arith.constant 0 : i32
    %c0_i32_0 = arith.constant 0 : i32
    %c0_i32_1 = arith.constant 0 : i32
    return %c0_i32, %c0_i32_0 : i32, i32
  }
  func.func @transform_4(%arg0: i32) -> (i32, i32) {
    %c0_i32 = arith.constant 0 : i32
    %c0_i32_0 = arith.constant 0 : i32
    %c0_i32_1 = arith.constant 0 : i32
    return %c0_i32, %c0_i32_0 : i32, i32
  }
  func.func @transform_5(%arg0: i32) -> (i32, i32) {
    %c0_i32 = arith.constant 0 : i32
    %c0_i32_0 = arith.constant 0 : i32
    %c0_i32_1 = arith.constant 0 : i32
    return %c0_i32, %c0_i32_0 : i32, i32
  }
  func.func @transform_6(%arg0: i32) -> (i32, i32) {
    %c0_i32 = arith.constant 0 : i32
    %c0_i32_0 = arith.constant 0 : i32
    %c0_i32_1 = arith.constant 0 : i32
    return %c0_i32, %c0_i32_0 : i32, i32
  }
  func.func @transform_7(%arg0: i32) -> (i32, i32) {
    %c0_i32 = arith.constant 0 : i32
    %c0_i32_0 = arith.constant 0 : i32
    return %arg0, %c0_i32 : i32, i32
  }
}

</mosaic_0001>

<bundles_post_ra>
// kernel: tpu_custom_call.1
= control target key start
LH: loop header
LB: loop body
LE: loop exit
PB: predicated region body
PF: predicated region fallthrough
CT: control target
= control target key end

     0   :  { %12 = vsyncpa [#allocation3], 0  ;;  %s934_s0 = inlined_call_operand.hbm [shape: bf16[8,512], index: 0, kind: input, shape index: {}]   ;;  %s935_s1 = inlined_call_operand.hbm [shape: bf16[512,128], index: 1, kind: input, shape index: {}]   ;;  %s936_s2 = inlined_call_operand.vmem [shape: f32[1,128], index: 2, kind: input, shape index: {}]   ;;  %s937_s3 = inlined_call_operand.hbm [shape: f32[128,128], index: 3, kind: input, shape index: {}]   ;;  %s938_s4 = inlined_call_operand.vmem [shape: f32[1,128], index: 4, kind: input, shape index: {}]   ;;  %s939_s5 = inlined_call_operand.hbm [shape: f32[128,128], index: 5, kind: input, shape index: {}]   ;;  %s940_s6 = inlined_call_operand.vmem [shape: f32[1,128], index: 6, kind: input, shape index: {}]   ;;  %s941_s7 = inlined_call_operand.hbm [shape: f32[8,128], index: 7, kind: output, shape index: {}]  }
   0x1   :  { %13 = vsyncpa [#allocation6], 0 }
   0x2   :  { %14 = vsyncpa [#allocation9], 0  ;;  %s31_s26 = sshll.u32 %s935_s1, 4  ;;  %s32_s26 = int_to_ptr.hbm [resolvable:$true] %s31_s26 }
   0x3   :  { %15 = vsyncpa [#allocation4], 0  ;;  %s861_s27 = smov [#allocation5]   ;;  %s21_s8 = sshll.u32 %s934_s0, 4  ;;  %s22_s8 = int_to_ptr.hbm [resolvable:$true] %s21_s8 }
   0x4   :  { %s33_s28 = sshll.u32 %s861_s27, 4  ;;  %s862_s9 = smov 64   ;;  %s34_s28 = int_to_ptr.vmem [resolvable:$true] %s33_s28 }
   0x5   :  { %s863_s10 = smov 4   ;;  %s864_s11 = smov [#allocation2]  }
   0x6   :  { %39 = dma.hbm_to_vmem [thread:$0]  %s32_s26, 4096, %s34_s28, [#allocation6], %s862_s9, %s862_s9, %s863_s10  }
   0x7   :  { %s23_s12 = sshll.u32 %s864_s11, 4  ;;  %s46_s15 = sshll.u32 %s937_s3, 4  ;;  %s24_s12 = int_to_ptr.vmem [resolvable:$true] %s23_s12  ;;  %s47_s15 = int_to_ptr.hbm [resolvable:$true] %s46_s15 }
   0x8   :  { %26 = dma.hbm_to_vmem [thread:$0]  %s22_s8, 256, %s24_s12, [#allocation3]  }
   0x9   :  { %s865_s1 = smov [#allocation7]   ;;  %s61_s0 = sshll.u32 %s939_s5, 4  ;;  %s62_s0 = int_to_ptr.hbm [resolvable:$true] %s61_s0 }
   0xa   :  { %s48_s16 = sshll.u32 %s865_s1, 4  ;;  %s866_s19 = smov 128   ;;  %s49_s16 = int_to_ptr.vmem [resolvable:$true] %s48_s16 }
   0xb   :  { %s867_s20 = smov 8   ;;  %s868_s21 = smov [#allocation8]  }
   0xc   :  { %54 = dma.hbm_to_vmem [thread:$0]  %s47_s15, 2048, %s49_s16, [#allocation6], %s866_s19, %s866_s19, %s867_s20  }
   0xd   :  { %s63_s22 = sshll.u32 %s868_s21, 4  ;;  %s64_s22 = int_to_ptr.vmem [resolvable:$true] %s63_s22 }
   0xe   :  { %69 = dma.hbm_to_vmem [thread:$0]  %s62_s0, 2048, %s64_s22, [#allocation9], %s866_s19, %s866_s19, %s867_s20  }
   0xf   :  { %853 = dma.done.wait [#allocation3], 256  }
  0x10   :  { %854 = vsyncadd [#allocation3], 4294967040 }
  0x11   :  { %855 = dma.done.wait [#allocation6], 6144  }
  0x12   :  { %856 = vsyncadd [#allocation6], 4294961152 }
  0x13   :  { %857 = dma.done.wait [#allocation9], 2048  }
  0x14   :  { %858 = vsyncadd [#allocation9], 4294965248  ;;  %v690_v0 = vld [vmem:[#allocation5 + $0x38] sm:$0xff]  ;;  %v689_v1 = vld [vmem:[#allocation5 + $0x30] sm:$0xff]  ;;  %s869_s25 = smov [#allocation10]  }
  0x15   :  { %364 = vmatpush.bf16.msra.mxu2 %v690_v0  ;;  %v698_v2 = vld [vmem:[#allocation5 + $0x78] sm:$0xff]  ;;  %v697_v4 = vld [vmem:[#allocation5 + $0x70] sm:$0xff]  ;;  %v688_v6 = vld [vmem:[#allocation5 + $0x28] sm:$0xff]  ;;  %s540_s26 = sshll.u32 %s869_s25, 4  ;;  %s541_s26 = int_to_ptr.vmem [resolvable:$true] %s540_s26 }
  0x16   :  { %v714_v3 = vld [vmem:[#allocation5 + $0xf8] sm:$0xff]  ;;  %377 = vmatpush.bf16.msra.mxu1 %v698_v2  ;;  %v713_v5 = vld [vmem:[#allocation5 + $0xf0] sm:$0xff]  ;;  %v696_v7 = vld [vmem:[#allocation5 + $0x68] sm:$0xff] }
  0x17   :  { %403 = vmatpush.bf16.msra.mxu3 %v714_v3  ;;  %v712_v8 = vld [vmem:[#allocation5 + $0xe8] sm:$0xff]  ;;  %v687_v9 = vld [vmem:[#allocation5 + $0x20] sm:$0xff]  ;;  %v686_v12 = vld [vmem:[#allocation5 + $0x18] sm:$0xff] }
  0x18   :  { %v695_v10 = vld [vmem:[#allocation5 + $0x60] sm:$0xff]  ;;  %v694_v13 = vld [vmem:[#allocation5 + $0x58] sm:$0xff]  ;;  %v685_v15 = vld [vmem:[#allocation5 + $0x10] sm:$0xff] }
  0x19   :  { %365 = vmatpush.bf16.msra.mxu2 %v689_v1  ;;  %v711_v11 = vld [vmem:[#allocation5 + $0xe0] sm:$0xff]  ;;  %v710_v14 = vld [vmem:[#allocation5 + $0xd8] sm:$0xff]  ;;  %v693_v16 = vld [vmem:[#allocation5 + $0x50] sm:$0xff] }
  0x1a   :  { %378 = vmatpush.bf16.msra.mxu1 %v697_v4  ;;  %v709_v17 = vld [vmem:[#allocation5 + $0xd0] sm:$0xff]  ;;  %v684_v18 = vld [vmem:[#allocation5 + $0x8] sm:$0xff]  ;;  %v89_v23 = vld [vmem:[#allocation2 + $0x8] sm:$0xff] }
  0x1b   :  { %404 = vmatpush.bf16.msra.mxu3 %v713_v5  ;;  %v88_v19 = vld [vmem:[#allocation2] sm:$0xff]  ;;  %v692_v20 = vld [vmem:[#allocation5 + $0x48] sm:$0xff]  ;;  %v683_v24 = vld [vmem:[#allocation5] sm:$0xff]  ;;  %v163_v29 = vunpack.c.h.b16 %v89_v23  ;;  %v162_v46 = vunpack.c.l.b16 %v89_v23 }
  0x1c   :  { %v708_v21 = vld [vmem:[#allocation5 + $0xc8] sm:$0xff]  ;;  %v160_v22 = vunpack.c.l.b16 %v88_v19  ;;  %v706_v25 = vld [vmem:[#allocation5 + $0xb8] sm:$0xff]  ;;  %v161_v26 = vunpack.c.h.b16 %v88_v19  ;;  %v691_v27 = vld [vmem:[#allocation5 + $0x40] sm:$0xff] }
  0x1d   :  { %366 = vmatpush.bf16.msra.mxu2 %v688_v6  ;;  %v707_v28 = vld [vmem:[#allocation5 + $0xc0] sm:$0xff]  ;;  %v434_v31 = vld [vmem:[#allocation7 + $0x78] sm:$0xff]  ;;  %v705_v32 = vld [vmem:[#allocation5 + $0xb0] sm:$0xff]  ;;  %v167_v34 = vpack.c.b16 %v163_v29, %v163_v29  ;;  %v166_v49 = vpack.c.b16 %v162_v46, %v162_v46 }
  0x1e   :  { %379 = vmatpush.bf16.msra.mxu1 %v696_v7  ;;  %v164_v30 = vpack.c.b16 %v160_v22, %v160_v22  ;;  %v165_v33 = vpack.c.b16 %v161_v26, %v161_v26  ;;  %435 = vmatpush.xpose.msra.mxu0 %v434_v31  ;;  %v433_v35 = vld [vmem:[#allocation7 + $0x70] sm:$0xff]  ;;  %v704_v36 = vld [vmem:[#allocation5 + $0xa8] sm:$0xff]  ;;  %v703_v38 = vld [vmem:[#allocation5 + $0xa0] sm:$0xff] }
  0x1f   :  { %405 = vmatpush.bf16.msra.mxu3 %v712_v8  ;;  %v432_v37 = vld [vmem:[#allocation7 + $0x68] sm:$0xff]  ;;  %v431_v39 = vld [vmem:[#allocation7 + $0x60] sm:$0xff]  ;;  %v702_v40 = vld [vmem:[#allocation5 + $0x98] sm:$0xff] }
  0x20   :  { %v430_v41 = vld [vmem:[#allocation7 + $0x58] sm:$0xff]  ;;  %v701_v42 = vld [vmem:[#allocation5 + $0x90] sm:$0xff]  ;;  %v700_v44 = vld [vmem:[#allocation5 + $0x88] sm:$0xff] }
  0x21   :  { %367 = vmatpush.bf16.msra.mxu2 %v687_v9  ;;  %v429_v43 = vld [vmem:[#allocation7 + $0x50] sm:$0xff]  ;;  %v428_v45 = vld [vmem:[#allocation7 + $0x48] sm:$0xff]  ;;  %v699_v47 = vld [vmem:[#allocation5 + $0x80] sm:$0xff] }
  0x22   :  { %380 = vmatpush.bf16.msra.mxu1 %v695_v10  ;;  %436 = vmatpush.xpose.msra.mxu0 %v433_v35  ;;  %v427_v48 = vld [vmem:[#allocation7 + $0x40] sm:$0xff]  ;;  %v426_v50 = vld [vmem:[#allocation7 + $0x38] sm:$0xff]  ;;  %v425_v51 = vld [vmem:[#allocation7 + $0x30] sm:$0xff] }
  0x23   :  { %406 = vmatpush.bf16.msra.mxu3 %v711_v11  ;;  %v424_v52 = vld [vmem:[#allocation7 + $0x28] sm:$0xff]  ;;  %v423_v53 = vld [vmem:[#allocation7 + $0x20] sm:$0xff]  ;;  %v422_v54 = vld [vmem:[#allocation7 + $0x18] sm:$0xff] }
  0x24   :  { %v421_v55 = vld [vmem:[#allocation7 + $0x10] sm:$0xff]  ;;  %v420_v56 = vld [vmem:[#allocation7 + $0x8] sm:$0xff]  ;;  %v419_v58 = vld [vmem:[#allocation7] sm:$0xff] }
  0x25   :  { %368 = vmatpush.bf16.msra.mxu2 %v686_v12  ;;  %v724_v0 = vld [vmem:[%s936_s2] ss:$0 sm:$0xff]  ;;  %v490_v8 = vld [vmem:[#allocation8 + $0x78] sm:$0xff]  ;;  %v488_v10 = vld [vmem:[#allocation8 + $0x68] sm:$0xff] }
  0x26   :  { %381 = vmatpush.bf16.msra.mxu1 %v694_v13  ;;  %437 = vmatpush.xpose.msra.mxu0 %v432_v37  ;;  %v489_v9 = vld [vmem:[#allocation8 + $0x70] sm:$0xff]  ;;  %v487_v11 = vld [vmem:[#allocation8 + $0x60] sm:$0xff]  ;;  %v486_v12 = vld [vmem:[#allocation8 + $0x58] sm:$0xff] }
  0x27   :  { %407 = vmatpush.bf16.msra.mxu3 %v710_v14  ;;  %v485_v13 = vld [vmem:[#allocation8 + $0x50] sm:$0xff]  ;;  %v484_v14 = vld [vmem:[#allocation8 + $0x48] sm:$0xff]  ;;  %v479_v19 = vld [vmem:[#allocation8 + $0x20] sm:$0xff] }
  0x28   :  { %v476_v22 = vld [vmem:[#allocation8 + $0x8] sm:$0xff]  ;;  %v475_v23 = vld [vmem:[#allocation8] sm:$0xff] }
  0x29   :  { %369 = vmatpush.bf16.msra.mxu2 %v685_v15  ;;  %v483_v15 = vld [vmem:[#allocation8 + $0x40] sm:$0xff] }
  0x2a   :  { %382 = vmatpush.bf16.msra.mxu1 %v693_v16  ;;  %438 = vmatpush.xpose.msra.mxu0 %v431_v39  ;;  %v482_v16 = vld [vmem:[#allocation8 + $0x38] sm:$0xff] }
  0x2b   :  { %408 = vmatpush.bf16.msra.mxu3 %v709_v17  ;;  %v481_v17 = vld [vmem:[#allocation8 + $0x30] sm:$0xff] }
  0x2d   :  { %370 = vmatpush.bf16.msra.mxu2 %v684_v18  ;;  %v480_v18 = vld [vmem:[#allocation8 + $0x28] sm:$0xff] }
  0x2e   :  { %383 = vmatpush.bf16.msra.mxu1 %v692_v20  ;;  %439 = vmatpush.xpose.msra.mxu0 %v430_v41  ;;  %v478_v20 = vld [vmem:[#allocation8 + $0x18] sm:$0xff]  ;;  %v726_v41 = vld [vmem:[%s940_s6] ss:$0 sm:$0xff]  ;;  %s542_s6 = sshll.u32 %s941_s7, 4  ;;  %s543_s6 = int_to_ptr.hbm [resolvable:$true] %s542_s6 }
  0x2f   :  { %409 = vmatpush.bf16.msra.mxu3 %v708_v21  ;;  %v477_v21 = vld [vmem:[#allocation8 + $0x10] sm:$0xff] }
  0x31   :  { %371 = vmatpush.bf16.msra.mxu2 %v683_v24  ;;  %v725_v24 = vld [vmem:[%s938_s4] ss:$0 sm:$0xff] }
  0x32   :  { %384 = vmatpush.bf16.msra.mxu1 %v691_v27  ;;  %440 = vmatpush.xpose.msra.mxu0 %v429_v43 }
  0x33   :  { %410 = vmatpush.bf16.msra.mxu3 %v707_v28 }
  0x34   :  { %372 = vmatmul.bf16.vlgmr.msra.gmra.mxu2 %v164_v30 }
  0x35   :  { %390 = vmatpush.bf16.msrb.mxu2 %v706_v25  ;;  %385 = vmatmul.bf16.vlgmr.msra.gmra.mxu1 %v165_v33 }
  0x36   :  { %411 = vmatmul.bf16.vlgmr.msra.gmra.mxu3 %v167_v34  ;;  %441 = vmatpush.xpose.msra.mxu0 %v428_v45 }
  0x37   :  { %495 = vmatpush.msrb.mxu1 %v490_v8 }
  0x39   :  { %391 = vmatpush.bf16.msrb.mxu2 %v705_v32  ;;  %496 = vmatpush.msrb.mxu1 %v489_v9 }
  0x3a   :  { %442 = vmatpush.xpose.msra.mxu0 %v427_v48 }
  0x3b   :  { %497 = vmatpush.msrb.mxu1 %v488_v10 }
  0x3d   :  { %392 = vmatpush.bf16.msrb.mxu2 %v704_v36  ;;  %498 = vmatpush.msrb.mxu1 %v487_v11 }
  0x3e   :  { %443 = vmatpush.xpose.msra.mxu0 %v426_v50 }
  0x3f   :  { %499 = vmatpush.msrb.mxu1 %v486_v12 }
  0x41   :  { %393 = vmatpush.bf16.msrb.mxu2 %v703_v38  ;;  %500 = vmatpush.msrb.mxu1 %v485_v13 }
  0x42   :  { %444 = vmatpush.xpose.msra.mxu0 %v425_v51 }
  0x43   :  { %501 = vmatpush.msrb.mxu1 %v484_v14 }
  0x45   :  { %394 = vmatpush.bf16.msrb.mxu2 %v702_v40  ;;  %502 = vmatpush.msrb.mxu1 %v483_v15 }
  0x46   :  { %445 = vmatpush.xpose.msra.mxu0 %v424_v52 }
  0x47   :  { %503 = vmatpush.msrb.mxu1 %v482_v16 }
  0x49   :  { %395 = vmatpush.bf16.msrb.mxu2 %v701_v42  ;;  %504 = vmatpush.msrb.mxu1 %v481_v17 }
  0x4a   :  { %446 = vmatpush.xpose.msra.mxu0 %v423_v53 }
  0x4b   :  { %505 = vmatpush.msrb.mxu1 %v480_v18 }
  0x4d   :  { %396 = vmatpush.bf16.msrb.mxu2 %v700_v44  ;;  %506 = vmatpush.msrb.mxu1 %v479_v19 }
  0x4e   :  { %447 = vmatpush.xpose.msra.mxu0 %v422_v54 }
  0x4f   :  { %507 = vmatpush.msrb.mxu1 %v478_v20 }
  0x51   :  { %397 = vmatpush.bf16.msrb.mxu2 %v699_v47  ;;  %508 = vmatpush.msrb.mxu1 %v477_v21 }
  0x52   :  { %448 = vmatpush.xpose.msra.mxu0 %v421_v55 }
  0x53   :  { %509 = vmatpush.msrb.mxu1 %v476_v22 }
  0x54   :  { %398 = vmatmul.bf16.vlgmr.msrb.gmra.mxu2 %v166_v49 }
  0x55   :  { %510 = vmatpush.msrb.mxu1 %v475_v23 }
  0x56   :  { %449 = vmatpush.xpose.msra.mxu0 %v420_v56 }
  0x5a   :  { %450 = vmatpush.xpose.msra.mxu0 %v419_v58 }
  0xb2   :  { %v386_v57 = vpop.f32.mrf.mxu1 }
  0xb7   :  { %v373_v59 = vpop.f32.mrf.mxu2 }
  0xb8   :  { %v374_v1 = vadd.f32 %v724_v0, %v373_v59 }
  0xb9   :  { %v412_v60 = vpop.f32.mrf.mxu3 }
  0xba   :  { %v388_v61 = vpop.f32.mrf.mxu1  ;;  %v387_v2 = vadd.f32 %v386_v57, %v374_v1 }
  0xbf   :  { %v375_v62 = vpop.f32.mrf.mxu2 }
  0xc1   :  { %v414_v63 = vpop.f32.mrf.mxu3 }
  0xd7   :  { %v399_v3 = vpop.f32.mrf.mxu2 }
  0xd8   :  { %v400_v4 = vadd.f32 %v399_v3, %v387_v2 }
  0xda   :  { %v413_v5 = vadd.f32 %v412_v60, %v400_v4 }
  0xdc   :  { %451 = vmatmul.f32.vlgmr.msra.gmra.mxu0 %v413_v5  ;;  %v416_v6 = vmul.f32 %v413_v5, %v413_v5 }
  0xde   :  { %417 = vadd.xlane.f32.xlu0 %v416_v6 }
  0xdf   :  { %v401_v7 = vpop.f32.mrf.mxu2 }
 0x151   :  { %v418_v25 = vpop.xlane.xlu0 %417 }
 0x152   :  { %v459_v27 = vadd.f32 %v725_v24, %v418_v25 }
 0x159   :  { %v452_v26 = vpop.f32.mrf.mxu0 }
 0x15a   :  { %v460_v28 = vmul.f32 2.0, %v452_v26 }
 0x15c   :  { %v461_v29 = vsub.f32 %v459_v27, %v460_v28 }
 0x15e   :  { %v462_v30 = vmax.f32 %v461_v29, 0.0 }
 0x160   :  { %727 = vrsqrt.f32 %v462_v30  ;;  %vm470_vm0 = vcmp.eq.f32.partialorder %v462_v30, inf  ;;  %v473_v38 = vand.u32 2147483648, %v462_v30  ;;  %vm472_vm1 = vcmp.eq.f32.partialorder %v462_v30, 0.0 }
 0x166   :  { %v728_v31 = vpop.eup %727 }
 0x167   :  { %v464_v32 = vmul.f32 %v728_v31, %v462_v30 }
 0x169   :  { %v465_v33 = vmul.f32 %v728_v31, %v464_v32 }
 0x16b   :  { %v466_v34 = vmul.f32 0.5, %v465_v33 }
 0x16d   :  { %v467_v35 = vsub.f32 1.5, %v466_v34 }
 0x16f   :  { %v468_v36 = vmul.f32 %v728_v31, %v467_v35 }
 0x171   :  { %v469_v37 = vmul.f32 %v468_v36, %v462_v30 }
 0x173   :  { %v471_v39 = vsel %vm470_vm0, %v462_v30, %v469_v37 }
 0x174   :  { %v474_v40 = vsel %vm472_vm1, %v473_v38, %v471_v39 }
 0x175   :  { %511 = vmatmul.f32.vlgmr.msrb.gmra.mxu1 %v474_v40 }
 0x1f2   :  { %v512_v42 = vpop.f32.mrf.mxu1 }
 0x1f3   :  { %v513_v43 = vadd.f32 %v726_v41, %v512_v42 }
 0x1f5   :  { %v682_v44 = vmul.f32 -1.442695, %v513_v43 }
 0x1f7   :  { %729 = vpow2.f32 %v682_v44 }
 0x1fd   :  { %v730_v45 = vpop.eup %729 }
 0x1fe   :  { %v518_v46 = vadd.f32 1.0, %v730_v45 }
 0x200   :  { %731 = vrcp.f32 %v518_v46  ;;  %v530_v50 = vand.u32 2147483648, %v518_v46  ;;  %v528_v52 = vand.u32 2147483647, %v518_v46  ;;  %vm524_vm3 = vweird.f32 %v518_v46 }
 0x202   :  { %v531_v54 = vor.u32 1.1754944e-38, %v530_v50  ;;  %vm529_vm5 = vcmp.eq.f32.partialorder %v528_v52, 8.507059e+37 }
 0x206   :  { %v732_v47 = vpop.eup %731 }
 0x207   :  { %v520_v48 = vmul.f32 %v732_v47, %v518_v46  ;;  %vm525_vm2 = vweird.f32 %v732_v47 }
 0x208   :  { %vm526_vm4 = vmor %vm524_vm3, %vm525_vm2 }
 0x209   :  { %v521_v49 = vsub.f32 1.0, %v520_v48 }
 0x20b   :  { %v522_v51 = vmul.f32 %v732_v47, %v521_v49 }
 0x20d   :  { %v523_v53 = vadd.f32 %v732_v47, %v522_v51 }
 0x20f   :  { %v527_v55 = vsel %vm526_vm4, %v732_v47, %v523_v53 }
 0x210   :  { %v532_v56 = vsel %vm529_vm5, %v531_v54, %v527_v55 }
 0x211   :  { %534 = vst [vmem:[#allocation10] sm:$0xff] %v532_v56 }
 0x212   :  { %545 = dma.vmem_to_hbm [thread:$0]  %s541_s26, 128, %s543_s6, [#allocation4]  }
 0x213   :  { %859 = dma.done.wait [#allocation4], 128  }
 0x214   :  { %860 = vsyncadd [#allocation4], 4294967168 }
 0x215   :  { %550 = vsyncpa [#allocation3], 1 }
 0x216   :  { %551 = vsyncpa [#allocation6], 1 }
 0x217   :  { %552 = vsyncpa [#allocation9], 1 }
 0x218   :  { %553 = vsyncpa [#allocation4], 1 }

</bundles_post_ra>
